<compile_context>
chip_gen: v7x
topology: tpu7x:2x2x1
jax: 0.10.0
libtpu: 0.0.40
codegen_flags: <defaults>
</compile_context>

<pallas_src>
import jax
import jax.numpy as jnp
from jax.experimental import pallas as pl
from jax.experimental.pallas import tpu as pltpu


def _tanh_kernel(x_ref, o_ref):
    # Elementwise tanh on the VMEM tile (EUP transcendental — effectively free
    # relative to HBM bandwidth for this memory-bound kernel).
    o_ref[...] = jnp.tanh(x_ref[...])


def _round_up(a: int, m: int) -> int:
    return ((a + m - 1) // m) * m


def _round_down(a: int, m: int) -> int:
    return (a // m) * m


def _make_in_spec(tile_r: int, C: int, num_steps: int):
    """Input BlockSpec; triple-buffered when the grid is long enough."""
    idx = lambda i: (i, 0)
    if num_steps >= 3:
        try:
            return pl.BlockSpec((tile_r, C), idx, pipeline_mode=pl.Buffered(3)), 3
        except (AttributeError, TypeError):
            pass  # older jax: fall back to the default double buffering
    return pl.BlockSpec((tile_r, C), idx), 2


def _tanh_2d(x2: jax.Array) -> jax.Array:
    """Pallas tanh on a lane-dense (rows, C) slab, C a multiple of 128."""
    rows, C = x2.shape
    dtype = x2.dtype
    itemsize = jnp.dtype(dtype).itemsize
    # Sublane packing: 8 rows for 32-bit, 16 for 16-bit, 32 for 8-bit dtypes.
    sub = 8 * max(1, 4 // itemsize)
    row_bytes = C * itemsize

    # ~4 MiB blocks (per review): amortizes per-step overhead, still small
    # enough that the full pipelined footprint fits every generation's VMEM.
    target_block_bytes = 4 * 1024 * 1024
    if rows <= sub:
        tile_r = rows  # tiny full-extent sublane block
    else:
        tile_r = _round_down(max(target_block_bytes // row_bytes, sub), sub)
        tile_r = max(sub, min(tile_r, _round_down(rows, sub)))

    num_steps = pl.cdiv(rows, tile_r)  # ragged last block is masked by Pallas
    in_spec, in_bufs = _make_in_spec(tile_r, C, num_steps)

    # Footprint-derived VMEM limit: in_bufs input + 2 output buffers + headroom.
    block_bytes = tile_r * row_bytes
    vmem_limit = max(16 * 1024 * 1024,
                     (in_bufs + 2) * block_bytes + 4 * 1024 * 1024)
    vmem_limit = min(vmem_limit, 48 * 1024 * 1024)  # stay safe on v7x (64 MiB)

    n = rows * C
    cost = pl.CostEstimate(
        flops=0,
        transcendentals=n,
        bytes_accessed=2 * n * itemsize,
    )

    return pl.pallas_call(
        _tanh_kernel,
        out_shape=jax.ShapeDtypeStruct((rows, C), dtype),
        grid_spec=pltpu.PrefetchScalarGridSpec(
            num_scalar_prefetch=0,
            grid=(num_steps,),
            in_specs=[in_spec],
            out_specs=pl.BlockSpec((tile_r, C), lambda i: (i, 0)),
        ),
        compiler_params=pltpu.CompilerParams(
            # "parallel" lets the row axis shard across v7x's two TensorCores;
            # it is a no-op on single-TC v5e/v6e.
            dimension_semantics=("parallel",),
            vmem_limit_bytes=vmem_limit,
        ),
        cost_estimate=cost,
    )(x2)


def tanh_pallas(x: jax.Array) -> jax.Array:
    """Elementwise tanh via a Pallas TPU kernel. Works for any shape/float dtype."""
    orig_shape = x.shape
    orig_dtype = x.dtype

    if not jnp.issubdtype(orig_dtype, jnp.floating):
        # TanH is only meaningful for float tensors (torch errors on ints).
        return jnp.tanh(x.astype(jnp.float32)).astype(orig_dtype)

    flat = x.reshape(-1)
    n = flat.shape[0]
    if n == 0:
        return jnp.tanh(x)

    itemsize = jnp.dtype(orig_dtype).itemsize
    sub = 8 * max(1, 4 // itemsize)

    # Pick a lane-dense column width C (multiple of 128) that divides n exactly
    # and leaves at least one full sublane-packed vreg of rows (unmasked vst).
    lane_candidates = (1024, 512, 256, 128)
    C = next((c for c in lane_candidates if n % c == 0 and n // c >= sub), None)
    if C is None:
        C = next((c for c in lane_candidates if n % c == 0), None)

    if C is not None:
        # Clean path: zero-copy reshape, no pad, no final slice.
        return _tanh_2d(flat.reshape(n // C, C)).reshape(orig_shape)

    # Ragged fallback: run Pallas on the largest 128-divisible prefix and
    # finish the (<128-element) tail with plain jnp.tanh. Avoids the old
    # jnp.pad + out[:n] pattern (two extra full HBM passes).
    C = 128
    n_prefix = _round_down(n, C)
    if n_prefix == 0:
        return jnp.tanh(x)  # fewer than 128 elements total
    prefix = _tanh_2d(flat[:n_prefix].reshape(n_prefix // C, C)).reshape(-1)
    tail = jnp.tanh(flat[n_prefix:])
    return jnp.concatenate([prefix, tail]).reshape(orig_shape)


if __name__ == "__main__":
    key = jax.random.PRNGKey(0)

    # Small NCHW-like input consistent with how this module is used in a conv net.
    x = jax.random.normal(key, (2, 4, 16, 16), dtype=jnp.float32)
    y = tanh_pallas(x)
    jax.block_until_ready(y)
    y_ref = jnp.tanh(x)
    assert y.shape == x.shape and y.dtype == x.dtype
    assert jnp.allclose(y, y_ref, atol=1e-6, rtol=1e-6)

    # Exercise the ragged / non-128-divisible path (prefix via Pallas + tail).
    x2 = jax.random.normal(jax.random.PRNGKey(1), (3, 50, 7), dtype=jnp.float32)
    y2 = tanh_pallas(x2)
    jax.block_until_ready(y2)
    assert y2.shape == x2.shape and y2.dtype == x2.dtype
    assert jnp.allclose(y2, jnp.tanh(x2), atol=1e-6, rtol=1e-6)

    # Tiny input (< 128 elements) hits the pure-jnp fallback.
    x3 = jax.random.normal(jax.random.PRNGKey(2), (3, 5, 7), dtype=jnp.float32)
    y3 = tanh_pallas(x3)
    jax.block_until_ready(y3)
    assert jnp.allclose(y3, jnp.tanh(x3), atol=1e-6, rtol=1e-6)

    print("KERNEL_OK")
</pallas_src>

<mosaic_0001>
module attributes {stable_mosaic.version = 11 : i64} {
  func.func @_tanh_kernel(%arg0: i32, %arg1: memref<8x256xf32, #tpu.memory_space<vmem>>, %arg2: memref<8x256xf32, #tpu.memory_space<vmem>>) attributes {dimension_semantics = [#tpu.dimension_semantics<parallel>], iteration_bounds = array<i64: 1>, scalar_prefetch = 0 : i64, scratch_operands = 0 : i64, tpu.core_type = #tpu.core_type<tc>, window_params = [{transform_indices = @transform_0, window_bounds = array<i64: 8, 256>}, {transform_indices = @transform_1, window_bounds = array<i64: 8, 256>}]} {
    %c0 = arith.constant 0 : index
    %c0_0 = arith.constant 0 : index
    %0 = vector.load %arg1[%c0, %c0_0] : memref<8x256xf32, #tpu.memory_space<vmem>>, vector<8x256xf32>
    %1 = math.tanh %0 : vector<8x256xf32>
    %c0_1 = arith.constant 0 : index
    %c0_2 = arith.constant 0 : index
    %2 = vector.load %arg2[%c0_1, %c0_2] : memref<8x256xf32, #tpu.memory_space<vmem>>, vector<8x256xf32>
    tpu.vector_store %arg2[%c0_1, %c0_2], %1 {strides = array<i32>} : memref<8x256xf32, #tpu.memory_space<vmem>>, vector<8x256xf32>,
    return
  }
  func.func @transform_0(%arg0: i32) -> (i32, i32) {
    %c0_i32 = arith.constant 0 : i32
    %c0_i32_0 = arith.constant 0 : i32
    return %arg0, %c0_i32 : i32, i32
  }
  func.func @transform_1(%arg0: i32) -> (i32, i32) {
    %c0_i32 = arith.constant 0 : i32
    %c0_i32_0 = arith.constant 0 : i32
    return %arg0, %c0_i32 : i32, i32
  }
}

</mosaic_0001>

<bundles_post_ra>
// kernel: tpu_custom_call.1
= control target key start
LH: loop header
LB: loop body
LE: loop exit
PB: predicated region body
PF: predicated region fallthrough
CT: control target
= control target key end

     0   :  { %6 = vsyncpa [#allocation3], 0  ;;  %s132_s0 = inlined_call_operand.hbm [shape: f32[8,256], index: 0, kind: input, shape index: {}]   ;;  %s133_s1 = inlined_call_operand.hbm [shape: f32[8,256], index: 1, kind: output, shape index: {}]  }
   0x1   :  { %7 = vsyncpa [#allocation4], 0  ;;  %s96_s6 = smov [#allocation2]   ;;  %s48_s10 = scalar_lea.hbm %s132_s0, 256 }
   0x2   :  { %s14_s7 = sshll.u32 %s96_s6, 4  ;;  %p49_p0 = scmp.ne.s32.totalorder %s132_s0, %s48_s10  ;;  %s15_s7 = int_to_ptr.vmem [resolvable:$true] %s14_s7 }
   0x3   :  { %p52_p1 = scmp.lt.u32.totalorder %s48_s10, %s132_s0 }
   0x5   :  { %p54_p2 = pnand %p52_p1, %p49_p0 }
   0x7   :  { %57 = shalt.err (!%p54_p2)
}
   0x8   :  { %s58_s15 = scalar_lea.vmem %s15_s7, 256  ;;  %p63_p4 = scmp.lt.s32.totalorder %s15_s7, %s15_s7 }
   0x9   :  { %p59_p3 = scmp.ne.s32.totalorder %s15_s7, %s58_s15  ;;  %p64_p5 = scmp.lt.s32.totalorder %s58_s15, %s58_s15 }
   0xb   :  { %p65_p6 = por %p64_p5, %p63_p4 }
   0xd   :  { %p66_p7 = pnand %p65_p6, %p59_p3 }
   0xf   :  { %69 = shalt.err (!%p66_p7)
}
  0x10   :  { %17 = dma.hbm_to_vmem [thread:$0]  %s132_s0, 256, %s15_s7, [#allocation3]  }
  0x11   :  { %92 = dma.done.wait [#allocation3], 256  }
  0x12   :  { %93 = vsyncadd [#allocation3], 4294967040  ;;  %v21_v0 = vld [vmem:[#allocation2] sm:$0xff]  ;;  %v22_v1 = vld [vmem:[#allocation2 + $0x8] sm:$0xff]  ;;  %s97_s18 = smov [#allocation5]  }
  0x13   :  { %44 = vtanh.f32 %v21_v0  ;;  %s33_s19 = sshll.u32 %s97_s18, 4  ;;  %s34_s19 = int_to_ptr.vmem [resolvable:$true] %s33_s19 }
  0x14   :  { %46 = vtanh.f32 %v22_v1  ;;  %s70_s20 = scalar_lea.vmem %s34_s19, 256  ;;  %p75_p9 = scmp.lt.s32.totalorder %s34_s19, %s34_s19 }
  0x15   :  { %p71_p8 = scmp.ne.s32.totalorder %s34_s19, %s70_s20  ;;  %p76_p10 = scmp.lt.s32.totalorder %s70_s20, %s70_s20 }
  0x17   :  { %p77_p11 = por %p76_p10, %p75_p9 }
  0x19   :  { %p78_p12 = pnand %p77_p11, %p71_p8 }
  0x1d   :  { %v45_v2 = vpop.eup %44 }
  0x1e   :  { %v47_v3 = vpop.eup %46  ;;  %25 = vst [vmem:[#allocation5] sm:$0xff] %v45_v2 }
  0x1f   :  { %26 = vst [vmem:[#allocation5 + $0x8] sm:$0xff] %v47_v3 }
  0x20   :  { %81 = shalt.err (!%p78_p12)
}
  0x21   :  { %s82_s22 = scalar_lea.hbm %s133_s1, 256 }
  0x22   :  { %p83_p13 = scmp.ne.s32.totalorder %s133_s1, %s82_s22  ;;  %p86_p0 = scmp.lt.u32.totalorder %s82_s22, %s133_s1 }
  0x24   :  { %p88_p1 = pnand %p86_p0, %p83_p13 }
  0x26   :  { %91 = shalt.err (!%p88_p1)
}
  0x27   :  { %36 = dma.vmem_to_hbm [thread:$0]  %s34_s19, 256, %s133_s1, [#allocation4]  }
  0x28   :  { %94 = dma.done.wait [#allocation4], 256  }
  0x29   :  { %95 = vsyncadd [#allocation4], 4294967040 }
  0x2a   :  { %40 = vsyncpa [#allocation3], 1 }
  0x2b   :  { %41 = vsyncpa [#allocation4], 1 }

</bundles_post_ra>
